<compile_context>
chip_gen: v5e
topology: v5e:2x2
jax: 0.10.0
libtpu: 0.0.40
codegen_flags: <defaults>
</compile_context>

<pallas_src>
import functools

import jax
import jax.numpy as jnp
from jax.experimental import pallas as pl
from jax.experimental.pallas import tpu as pltpu


# ---------------------------------------------------------------------------
# Fused Pallas kernel: all layers + residual + log_softmax for one row tile
# ---------------------------------------------------------------------------

def _fused_mlp_kernel(*refs, num_layers, c_out_valid, add_residual):
    """refs = (x_ref, w0, b0, w1, b1, ..., w_{L-1}, b_{L-1}, o_ref).

    x_ref : [TILE_N, C_in_pad]      (fp32)
    w_i   : [C_i_pad, C_{i+1}_pad]  (fp32, already Wl+Wr folded, zero padded)
    b_i   : [1, C_{i+1}_pad]        (fp32, zero padded)
    o_ref : [TILE_N, C_out_pad]     (fp32)
    """
    x_ref = refs[0]
    o_ref = refs[1 + 2 * num_layers]

    x = x_ref[...]
    h = x
    for i in range(num_layers):
        w = refs[1 + 2 * i][...]
        b = refs[2 + 2 * i][...]
        # Single MXU matmul per layer (Wl+Wr folded in wrapper), fp32 accum.
        h = jnp.dot(h, w, preferred_element_type=jnp.float32) + b
        if i != num_layers - 1:
            h = jnp.maximum(h, 0.0)

    if add_residual:
        h = h + x  # valid only when (unpadded) C_out == C_in; checked in wrapper

    # Mask zero-padded output columns so they don't pollute the softmax sum.
    col = jax.lax.broadcasted_iota(jnp.int32, h.shape, 1)
    h = jnp.where(col < c_out_valid, h, -jnp.inf)

    # Numerically stable log_softmax along the channel axis (EUP exp/log).
    m = jnp.max(h, axis=-1, keepdims=True)
    s = h - m
    lse = jnp.log(jnp.sum(jnp.exp(s), axis=-1, keepdims=True))
    o_ref[...] = (s - lse).astype(o_ref.dtype)


# ---------------------------------------------------------------------------
# Python wrapper: padding, weight folding, BlockSpecs, grid
# ---------------------------------------------------------------------------

def _round_up(v, m):
    return ((v + m - 1) // m) * m


def mlp_forward(x, params):
    """x: [N, C_in] fp32; params: list of (w_l [Cin,Cout], w_r [Cin,Cout], b [Cout])."""
    n, c_in = x.shape
    num_layers = len(params)
    c_out = params[-1][2].shape[0]
    add_residual = (c_out == c_in)  # mirrors `if x.shape[1] == prev_x.shape[1]`

    # Channel dims per layer, padded up to the 128-lane width.
    dims = [c_in] + [p[0].shape[1] for p in params]
    pdims = [_round_up(d, 128) for d in dims]

    # Fold Wl+Wr and zero-pad weights / biases to lane-dense shapes.
    folded = []
    for i, (w_l, w_r, b) in enumerate(params):
        w = w_l + w_r  # x @ Wl + x @ Wr == x @ (Wl + Wr)
        w_p = jnp.zeros((pdims[i], pdims[i + 1]), jnp.float32)
        w_p = w_p.at[: dims[i], : dims[i + 1]].set(w)
        b_p = jnp.zeros((1, pdims[i + 1]), jnp.float32)
        b_p = b_p.at[0, : dims[i + 1]].set(b)
        folded += [w_p, b_p]

    # Row tiling: modest tiles, multiples of 8 sublanes; grid axis is parallel.
    tile_n = 256 if n >= 256 else _round_up(n, 8)
    n_pad = _round_up(n, tile_n)
    c_in_p, c_out_p = pdims[0], pdims[-1]

    x_p = jnp.zeros((n_pad, c_in_p), jnp.float32).at[:n, :c_in].set(x)

    grid = (n_pad // tile_n,)
    in_specs = [pl.BlockSpec((tile_n, c_in_p), lambda i: (i, 0))]
    for li in range(num_layers):
        in_specs.append(pl.BlockSpec((pdims[li], pdims[li + 1]), lambda i: (0, 0)))
        in_specs.append(pl.BlockSpec((1, pdims[li + 1]), lambda i: (0, 0)))
    out_spec = pl.BlockSpec((tile_n, c_out_p), lambda i: (i, 0))

    kernel = functools.partial(
        _fused_mlp_kernel,
        num_layers=num_layers,
        c_out_valid=c_out,
        add_residual=add_residual,
    )

    out_padded = pl.pallas_call(
        kernel,
        out_shape=jax.ShapeDtypeStruct((n_pad, c_out_p), jnp.float32),
        grid=grid,
        in_specs=in_specs,
        out_specs=out_spec,
        compiler_params=pltpu.CompilerParams(
            dimension_semantics=("parallel",),
        ),
    )(x_p, *folded)

    return out_padded[:n, :c_out]


# ---------------------------------------------------------------------------
# Parameter init (PyTorch-Linear-style uniform), weights stored [C_in, C_out]
# ---------------------------------------------------------------------------

def init_mlp_params(key, in_channels, hidden_channels, out_channels, num_layers):
    dims = [in_channels] + [hidden_channels] * (num_layers - 1) + [out_channels]
    params = []
    for i in range(num_layers):
        c_in, c_out = dims[i], dims[i + 1]
        key, k1, k2, k3 = jax.random.split(key, 4)
        bound = 1.0 / jnp.sqrt(c_in)
        w_l = jax.random.uniform(k1, (c_in, c_out), jnp.float32, -bound, bound)
        w_r = jax.random.uniform(k2, (c_in, c_out), jnp.float32, -bound, bound)
        b = jax.random.uniform(k3, (c_out,), jnp.float32, -bound, bound)
        params.append((w_l, w_r, b))
    return params


# ---------------------------------------------------------------------------
# Pure-JAX reference (unfolded weights) for correctness check
# ---------------------------------------------------------------------------

def mlp_reference(x, params):
    prev_x = x
    num_layers = len(params)
    for i, (w_l, w_r, b) in enumerate(params):
        x = x @ w_l + b + x @ w_r
        if i != num_layers - 1:
            x = jnp.maximum(x, 0.0)
    if x.shape[1] == prev_x.shape[1]:
        x = x + prev_x
    return jax.nn.log_softmax(x, axis=-1)


if __name__ == "__main__":
    # Small shapes: 8 nodes, in=16, hidden=32, out=16 (residual path triggers).
    key = jax.random.PRNGKey(0)
    key, kx = jax.random.split(key)
    N, C_IN, C_HID, C_OUT, NUM_LAYERS = 8, 16, 32, 16, 3

    x = jax.random.normal(kx, (N, C_IN), jnp.float32)
    params = init_mlp_params(key, C_IN, C_HID, C_OUT, NUM_LAYERS)

    out = mlp_forward(x, params)
    out = jax.block_until_ready(out)

    ref = mlp_reference(x, params)
    assert out.shape == (N, C_OUT)
    assert jnp.allclose(out, ref, atol=1e-4, rtol=1e-4), float(
        jnp.max(jnp.abs(out - ref))
    )

    print("KERNEL_OK")
</pallas_src>

<mosaic_0001>
module attributes {stable_mosaic.version = 11 : i64} {
  func.func @_fused_mlp_kernel(%arg0: i32, %arg1: memref<8x128xf32, #tpu.memory_space<vmem>>, %arg2: memref<128x128xf32, #tpu.memory_space<vmem>>, %arg3: memref<1x128xf32, #tpu.memory_space<vmem>>, %arg4: memref<128x128xf32, #tpu.memory_space<vmem>>, %arg5: memref<1x128xf32, #tpu.memory_space<vmem>>, %arg6: memref<128x128xf32, #tpu.memory_space<vmem>>, %arg7: memref<1x128xf32, #tpu.memory_space<vmem>>, %arg8: memref<8x128xf32, #tpu.memory_space<vmem>>) attributes {dimension_semantics = [#tpu.dimension_semantics<parallel>], iteration_bounds = array<i64: 1>, scalar_prefetch = 0 : i64, scratch_operands = 0 : i64, tpu.core_type = #tpu.core_type<tc>, window_params = [{transform_indices = @transform_0, window_bounds = array<i64: 8, 128>}, {pipeline_mode = #tpu.pipeline_mode<synchronous>, transform_indices = @transform_1, window_bounds = array<i64: 128, 128>}, {pipeline_mode = #tpu.pipeline_mode<synchronous>, transform_indices = @transform_2, window_bounds = array<i64: 1, 128>}, {pipeline_mode = #tpu.pipeline_mode<synchronous>, transform_indices = @transform_3, window_bounds = array<i64: 128, 128>}, {pipeline_mode = #tpu.pipeline_mode<synchronous>, transform_indices = @transform_4, window_bounds = array<i64: 1, 128>}, {pipeline_mode = #tpu.pipeline_mode<synchronous>, transform_indices = @transform_5, window_bounds = array<i64: 128, 128>}, {pipeline_mode = #tpu.pipeline_mode<synchronous>, transform_indices = @transform_6, window_bounds = array<i64: 1, 128>}, {transform_indices = @transform_7, window_bounds = array<i64: 8, 128>}]} {
    %c0 = arith.constant 0 : index
    %c0_0 = arith.constant 0 : index
    %0 = vector.load %arg1[%c0, %c0_0] : memref<8x128xf32, #tpu.memory_space<vmem>>, vector<8x128xf32>
    %c0_1 = arith.constant 0 : index
    %c0_2 = arith.constant 0 : index
    %1 = vector.load %arg2[%c0_1, %c0_2] : memref<128x128xf32, #tpu.memory_space<vmem>>, vector<128x128xf32>
    %c0_3 = arith.constant 0 : index
    %c0_4 = arith.constant 0 : index
    %2 = vector.load %arg3[%c0_3, %c0_4] : memref<1x128xf32, #tpu.memory_space<vmem>>, vector<1x128xf32>
    %cst = arith.constant dense<0.000000e+00> : vector<8x128xf32>
    %3 = tpu.matmul %0, %1, %cst {dimension_numbers = #tpu.dot_dimension_numbers<[1], [0], [0], [1], [0, 0, 1, 1], [], []>} : vector<8x128xf32>, vector<128x128xf32>, vector<8x128xf32> -> vector<8x128xf32>
    %4 = vector.broadcast %2 : vector<1x128xf32> to vector<8x128xf32>
    %5 = arith.addf %3, %4 : vector<8x128xf32>
    %cst_5 = arith.constant 0.000000e+00 : f32
    %6 = vector.broadcast %cst_5 : f32 to vector<8x128xf32>
    %7 = arith.maximumf %5, %6 : vector<8x128xf32>
    %c0_6 = arith.constant 0 : index
    %c0_7 = arith.constant 0 : index
    %8 = vector.load %arg4[%c0_6, %c0_7] : memref<128x128xf32, #tpu.memory_space<vmem>>, vector<128x128xf32>
    %c0_8 = arith.constant 0 : index
    %c0_9 = arith.constant 0 : index
    %9 = vector.load %arg5[%c0_8, %c0_9] : memref<1x128xf32, #tpu.memory_space<vmem>>, vector<1x128xf32>
    %cst_10 = arith.constant dense<0.000000e+00> : vector<8x128xf32>
    %10 = tpu.matmul %7, %8, %cst_10 {dimension_numbers = #tpu.dot_dimension_numbers<[1], [0], [0], [1], [0, 0, 1, 1], [], []>} : vector<8x128xf32>, vector<128x128xf32>, vector<8x128xf32> -> vector<8x128xf32>
    %11 = vector.broadcast %9 : vector<1x128xf32> to vector<8x128xf32>
    %12 = arith.addf %10, %11 : vector<8x128xf32>
    %cst_11 = arith.constant 0.000000e+00 : f32
    %13 = vector.broadcast %cst_11 : f32 to vector<8x128xf32>
    %14 = arith.maximumf %12, %13 : vector<8x128xf32>
    %c0_12 = arith.constant 0 : index
    %c0_13 = arith.constant 0 : index
    %15 = vector.load %arg6[%c0_12, %c0_13] : memref<128x128xf32, #tpu.memory_space<vmem>>, vector<128x128xf32>
    %c0_14 = arith.constant 0 : index
    %c0_15 = arith.constant 0 : index
    %16 = vector.load %arg7[%c0_14, %c0_15] : memref<1x128xf32, #tpu.memory_space<vmem>>, vector<1x128xf32>
    %cst_16 = arith.constant dense<0.000000e+00> : vector<8x128xf32>
    %17 = tpu.matmul %14, %15, %cst_16 {dimension_numbers = #tpu.dot_dimension_numbers<[1], [0], [0], [1], [0, 0, 1, 1], [], []>} : vector<8x128xf32>, vector<128x128xf32>, vector<8x128xf32> -> vector<8x128xf32>
    %18 = vector.broadcast %16 : vector<1x128xf32> to vector<8x128xf32>
    %19 = arith.addf %17, %18 : vector<8x128xf32>
    %20 = arith.addf %19, %0 : vector<8x128xf32>
    %21 = tpu.iota {dimensions = array<i32: 1>} : vector<8x128xi32>
    %c16_i32 = arith.constant 16 : i32
    %22 = vector.broadcast %c16_i32 : i32 to vector<8x128xi32>
    %23 = arith.cmpi slt, %21, %22 : vector<8x128xi32>
    %cst_17 = arith.constant 0xFF800000 : f32
    %24 = vector.broadcast %cst_17 : f32 to vector<8x128xf32>
    %25 = arith.select %23, %20, %24 : vector<8x128xi1>, vector<8x128xf32>
    %cst_18 = arith.constant dense<0xFF800000> : vector<8xf32>
    %26 = vector.multi_reduction <maximumf>, %25, %cst_18 [1] : vector<8x128xf32> to vector<8xf32>
    %27 = vector.shape_cast %26 : vector<8xf32> to vector<8x1xf32>
    %28 = vector.broadcast %27 : vector<8x1xf32> to vector<8x128xf32>
    %29 = arith.subf %25, %28 : vector<8x128xf32>
    %30 = math.exp %29 : vector<8x128xf32>
    %cst_19 = arith.constant dense<0.000000e+00> : vector<8xf32>
    %31 = vector.multi_reduction <add>, %30, %cst_19 [1] : vector<8x128xf32> to vector<8xf32>
    %32 = vector.shape_cast %31 : vector<8xf32> to vector<8x1xf32>
    %33 = math.log %32 : vector<8x1xf32>
    %34 = vector.broadcast %33 : vector<8x1xf32> to vector<8x128xf32>
    %35 = arith.subf %29, %34 : vector<8x128xf32>
    %c0_20 = arith.constant 0 : index
    %c0_21 = arith.constant 0 : index
    %36 = vector.load %arg8[%c0_20, %c0_21] : memref<8x128xf32, #tpu.memory_space<vmem>>, vector<8x128xf32>
    tpu.vector_store %arg8[%c0_20, %c0_21], %35 {strides = array<i32>} : memref<8x128xf32, #tpu.memory_space<vmem>>, vector<8x128xf32>,
    return
  }
  func.func @transform_0(%arg0: i32) -> (i32, i32) {
    %c0_i32 = arith.constant 0 : i32
    %c0_i32_0 = arith.constant 0 : i32
    return %arg0, %c0_i32 : i32, i32
  }
  func.func @transform_1(%arg0: i32) -> (i32, i32) {
    %c0_i32 = arith.constant 0 : i32
    %c0_i32_0 = arith.constant 0 : i32
    %c0_i32_1 = arith.constant 0 : i32
    return %c0_i32, %c0_i32_0 : i32, i32
  }
  func.func @transform_2(%arg0: i32) -> (i32, i32) {
    %c0_i32 = arith.constant 0 : i32
    %c0_i32_0 = arith.constant 0 : i32
    %c0_i32_1 = arith.constant 0 : i32
    return %c0_i32, %c0_i32_0 : i32, i32
  }
  func.func @transform_3(%arg0: i32) -> (i32, i32) {
    %c0_i32 = arith.constant 0 : i32
    %c0_i32_0 = arith.constant 0 : i32
    %c0_i32_1 = arith.constant 0 : i32
    return %c0_i32, %c0_i32_0 : i32, i32
  }
  func.func @transform_4(%arg0: i32) -> (i32, i32) {
    %c0_i32 = arith.constant 0 : i32
    %c0_i32_0 = arith.constant 0 : i32
    %c0_i32_1 = arith.constant 0 : i32
    return %c0_i32, %c0_i32_0 : i32, i32
  }
  func.func @transform_5(%arg0: i32) -> (i32, i32) {
    %c0_i32 = arith.constant 0 : i32
    %c0_i32_0 = arith.constant 0 : i32
    %c0_i32_1 = arith.constant 0 : i32
    return %c0_i32, %c0_i32_0 : i32, i32
  }
  func.func @transform_6(%arg0: i32) -> (i32, i32) {
    %c0_i32 = arith.constant 0 : i32
    %c0_i32_0 = arith.constant 0 : i32
    %c0_i32_1 = arith.constant 0 : i32
    return %c0_i32, %c0_i32_0 : i32, i32
  }
  func.func @transform_7(%arg0: i32) -> (i32, i32) {
    %c0_i32 = arith.constant 0 : i32
    %c0_i32_0 = arith.constant 0 : i32
    return %arg0, %c0_i32 : i32, i32
  }
}

</mosaic_0001>

<bundles_post_ra>
// kernel: tpu_custom_call.1
= control target key start
LH: loop header
LB: loop body
LE: loop exit
PB: predicated region body
PF: predicated region fallthrough
CT: control target
= control target key end

     0   :  { %12 = vsyncpa [#allocation3], 0  ;;  %s459_s0 = inlined_call_operand.hbm [shape: f32[8,128], index: 0, kind: input, shape index: {}]   ;;  %s460_s1 = inlined_call_operand.hbm [shape: f32[128,128], index: 1, kind: input, shape index: {}]   ;;  %s461_s2 = inlined_call_operand.vmem [shape: f32[1,128], index: 2, kind: input, shape index: {}]   ;;  %s462_s3 = inlined_call_operand.hbm [shape: f32[128,128], index: 3, kind: input, shape index: {}]   ;;  %s463_s4 = inlined_call_operand.vmem [shape: f32[1,128], index: 4, kind: input, shape index: {}]   ;;  %s464_s5 = inlined_call_operand.hbm [shape: f32[128,128], index: 5, kind: input, shape index: {}]   ;;  %s465_s6 = inlined_call_operand.vmem [shape: f32[1,128], index: 6, kind: input, shape index: {}]   ;;  %s466_s7 = inlined_call_operand.hbm [shape: f32[8,128], index: 7, kind: output, shape index: {}]  }
   0x1   :  { %13 = vsyncpa [#allocation6], 0 }
   0x2   :  { %14 = vsyncpa [#allocation9], 0  ;;  %s31_s26 = sshll.u32 %s460_s1, 4  ;;  %s32_s26 = int_to_ptr.hbm [resolvable:$true] %s31_s26 }
   0x3   :  { %15 = vsyncpa [#allocation4], 0  ;;  %s388_s27 = smov [#allocation5]   ;;  %s21_s8 = sshll.u32 %s459_s0, 4  ;;  %s22_s8 = int_to_ptr.hbm [resolvable:$true] %s21_s8 }
   0x4   :  { %s33_s28 = sshll.u32 %s388_s27, 4  ;;  %s389_s9 = smov 128   ;;  %s34_s28 = int_to_ptr.vmem [resolvable:$true] %s33_s28 }
   0x5   :  { %s390_s10 = smov 8   ;;  %s391_s11 = smov [#allocation2]  }
   0x6   :  { %39 = dma.hbm_to_vmem [thread:$0]  %s32_s26, 2048, %s34_s28, [#allocation6], %s389_s9, %s389_s9, %s390_s10  }
   0x7   :  { %s23_s12 = sshll.u32 %s391_s11, 4  ;;  %s46_s15 = sshll.u32 %s462_s3, 4  ;;  %s24_s12 = int_to_ptr.vmem [resolvable:$true] %s23_s12  ;;  %s47_s15 = int_to_ptr.hbm [resolvable:$true] %s46_s15 }
   0x8   :  { %26 = dma.hbm_to_vmem [thread:$0]  %s22_s8, 128, %s24_s12, [#allocation3]  }
   0x9   :  { %s61_s17 = sshll.u32 %s464_s5, 4  ;;  %s392_s18 = smov [#allocation7]   ;;  %s62_s17 = int_to_ptr.hbm [resolvable:$true] %s61_s17 }
   0xa   :  { %s48_s19 = sshll.u32 %s392_s18, 4  ;;  %s393_s0 = smov [#allocation8]   ;;  %s49_s19 = int_to_ptr.vmem [resolvable:$true] %s48_s19 }
   0xb   :  { %54 = dma.hbm_to_vmem [thread:$0]  %s47_s15, 2048, %s49_s19, [#allocation6], %s389_s9, %s389_s9, %s390_s10  }
   0xc   :  { %s63_s20 = sshll.u32 %s393_s0, 4  ;;  %s64_s20 = int_to_ptr.vmem [resolvable:$true] %s63_s20 }
   0xd   :  { %69 = dma.hbm_to_vmem [thread:$0]  %s62_s17, 2048, %s64_s20, [#allocation9], %s389_s9, %s389_s9, %s390_s10  }
   0xe   :  { %380 = dma.done.wait [#allocation3], 128  }
   0xf   :  { %381 = vsyncadd [#allocation3], 4294967168 }
  0x10   :  { %382 = dma.done.wait [#allocation6], 4096  }
  0x11   :  { %383 = vsyncadd [#allocation6], 4294963200 }
  0x12   :  { %384 = dma.done.wait [#allocation9], 2048  }
  0x13   :  { %385 = vsyncadd [#allocation9], 4294965248  ;;  %v104_v0 = vld [vmem:[#allocation5 + $0x78] sm:$0xff]  ;;  %v103_v1 = vld [vmem:[#allocation5 + $0x70] sm:$0xff]  ;;  %v212_v57 = vlaneseq  ;;  %s234_s26 = sshll.u32 %s466_s7, 4  ;;  %s235_s26 = int_to_ptr.hbm [resolvable:$true] %s234_s26 }
  0x14   :  { %109 = vmatpush.msra.mxu0 %v104_v0  ;;  %v102_v2 = vld [vmem:[#allocation5 + $0x68] sm:$0xff]  ;;  %v101_v3 = vld [vmem:[#allocation5 + $0x60] sm:$0xff]  ;;  %v145_v4 = vld [vmem:[#allocation7 + $0x78] sm:$0xff] }
  0x15   :  { %v100_v5 = vld [vmem:[#allocation5 + $0x58] sm:$0xff]  ;;  %150 = vmatpush.msra.mxu1 %v145_v4  ;;  %v144_v6 = vld [vmem:[#allocation7 + $0x70] sm:$0xff]  ;;  %v143_v7 = vld [vmem:[#allocation7 + $0x68] sm:$0xff]  ;;  %v213_v59 = vand.u32 127, %v212_v57 }
  0x16   :  { %110 = vmatpush.msra.mxu0 %v103_v1  ;;  %v99_v8 = vld [vmem:[#allocation5 + $0x50] sm:$0xff]  ;;  %v142_v9 = vld [vmem:[#allocation7 + $0x60] sm:$0xff]  ;;  %v98_v10 = vld [vmem:[#allocation5 + $0x48] sm:$0xff] }
  0x17   :  { %151 = vmatpush.msra.mxu1 %v144_v6  ;;  %v141_v11 = vld [vmem:[#allocation7 + $0x58] sm:$0xff]  ;;  %v97_v12 = vld [vmem:[#allocation5 + $0x40] sm:$0xff]  ;;  %v140_v13 = vld [vmem:[#allocation7 + $0x50] sm:$0xff]  ;;  %vm214_vm0 = vcmp.lt.s32.totalorder %v213_v59, 16 }
  0x18   :  { %111 = vmatpush.msra.mxu0 %v102_v2  ;;  %v96_v14 = vld [vmem:[#allocation5 + $0x38] sm:$0xff]  ;;  %v139_v15 = vld [vmem:[#allocation7 + $0x48] sm:$0xff]  ;;  %v95_v16 = vld [vmem:[#allocation5 + $0x30] sm:$0xff] }
  0x19   :  { %152 = vmatpush.msra.mxu1 %v143_v7  ;;  %v138_v17 = vld [vmem:[#allocation7 + $0x40] sm:$0xff]  ;;  %v94_v18 = vld [vmem:[#allocation5 + $0x28] sm:$0xff]  ;;  %v137_v19 = vld [vmem:[#allocation7 + $0x38] sm:$0xff] }
  0x1a   :  { %112 = vmatpush.msra.mxu0 %v101_v3  ;;  %v93_v20 = vld [vmem:[#allocation5 + $0x20] sm:$0xff]  ;;  %v136_v21 = vld [vmem:[#allocation7 + $0x30] sm:$0xff]  ;;  %v92_v22 = vld [vmem:[#allocation5 + $0x18] sm:$0xff] }
  0x1b   :  { %153 = vmatpush.msra.mxu1 %v142_v9  ;;  %v135_v23 = vld [vmem:[#allocation7 + $0x28] sm:$0xff]  ;;  %v91_v24 = vld [vmem:[#allocation5 + $0x10] sm:$0xff]  ;;  %v134_v25 = vld [vmem:[#allocation7 + $0x20] sm:$0xff] }
  0x1c   :  { %113 = vmatpush.msra.mxu0 %v100_v5  ;;  %v90_v26 = vld [vmem:[#allocation5 + $0x8] sm:$0xff]  ;;  %v133_v27 = vld [vmem:[#allocation7 + $0x18] sm:$0xff]  ;;  %v89_v28 = vld [vmem:[#allocation5] sm:$0xff] }
  0x1d   :  { %154 = vmatpush.msra.mxu1 %v141_v11  ;;  %v88_v29 = vld [vmem:[#allocation2] sm:$0xff]  ;;  %v132_v30 = vld [vmem:[#allocation7 + $0x10] sm:$0xff]  ;;  %v131_v31 = vld [vmem:[#allocation7 + $0x8] sm:$0xff] }
  0x1e   :  { %114 = vmatpush.msra.mxu0 %v99_v8  ;;  %v130_v32 = vld [vmem:[#allocation7] sm:$0xff]  ;;  %v186_v33 = vld [vmem:[#allocation8 + $0x78] sm:$0xff]  ;;  %v185_v34 = vld [vmem:[#allocation8 + $0x70] sm:$0xff] }
  0x1f   :  { %155 = vmatpush.msra.mxu1 %v140_v13  ;;  %191 = vmatpush.msra.mxu2 %v186_v33  ;;  %v184_v35 = vld [vmem:[#allocation8 + $0x68] sm:$0xff]  ;;  %v183_v36 = vld [vmem:[#allocation8 + $0x60] sm:$0xff]  ;;  %v182_v37 = vld [vmem:[#allocation8 + $0x58] sm:$0xff] }
  0x20   :  { %115 = vmatpush.msra.mxu0 %v98_v10  ;;  %v181_v38 = vld [vmem:[#allocation8 + $0x50] sm:$0xff]  ;;  %v180_v39 = vld [vmem:[#allocation8 + $0x48] sm:$0xff]  ;;  %v179_v40 = vld [vmem:[#allocation8 + $0x40] sm:$0xff] }
  0x21   :  { %156 = vmatpush.msra.mxu1 %v139_v15  ;;  %192 = vmatpush.msra.mxu2 %v185_v34  ;;  %v178_v41 = vld [vmem:[#allocation8 + $0x38] sm:$0xff]  ;;  %v177_v42 = vld [vmem:[#allocation8 + $0x30] sm:$0xff]  ;;  %v176_v43 = vld [vmem:[#allocation8 + $0x28] sm:$0xff] }
  0x22   :  { %116 = vmatpush.msra.mxu0 %v97_v12  ;;  %v175_v44 = vld [vmem:[#allocation8 + $0x20] sm:$0xff]  ;;  %v174_v45 = vld [vmem:[#allocation8 + $0x18] sm:$0xff]  ;;  %v173_v50 = vld [vmem:[#allocation8 + $0x10] sm:$0xff] }
  0x23   :  { %157 = vmatpush.msra.mxu1 %v138_v17  ;;  %193 = vmatpush.msra.mxu2 %v184_v35  ;;  %v253_v46 = vld [vmem:[%s461_s2] ss:$0 sm:$0xff]  ;;  %v172_v51 = vld [vmem:[#allocation8 + $0x8] sm:$0xff]  ;;  %v171_v52 = vld [vmem:[#allocation8] sm:$0xff] }
  0x24   :  { %117 = vmatpush.msra.mxu0 %v96_v14  ;;  %v254_v53 = vld [vmem:[%s463_s4] ss:$0 sm:$0xff]  ;;  %s394_s4 = smov [#allocation10]  }
  0x25   :  { %158 = vmatpush.msra.mxu1 %v137_v19  ;;  %194 = vmatpush.msra.mxu2 %v183_v36  ;;  %v255_v58 = vld [vmem:[%s465_s6] ss:$0 sm:$0xff]  ;;  %s232_s24 = sshll.u32 %s394_s4, 4  ;;  %s233_s24 = int_to_ptr.vmem [resolvable:$true] %s232_s24 }
  0x26   :  { %118 = vmatpush.msra.mxu0 %v95_v16 }
  0x27   :  { %159 = vmatpush.msra.mxu1 %v136_v21  ;;  %195 = vmatpush.msra.mxu2 %v182_v37 }
  0x28   :  { %119 = vmatpush.msra.mxu0 %v94_v18 }
  0x29   :  { %160 = vmatpush.msra.mxu1 %v135_v23  ;;  %196 = vmatpush.msra.mxu2 %v181_v38 }
  0x2a   :  { %120 = vmatpush.msra.mxu0 %v93_v20 }
  0x2b   :  { %161 = vmatpush.msra.mxu1 %v134_v25  ;;  %197 = vmatpush.msra.mxu2 %v180_v39 }
  0x2c   :  { %121 = vmatpush.msra.mxu0 %v92_v22 }
  0x2d   :  { %162 = vmatpush.msra.mxu1 %v133_v27  ;;  %198 = vmatpush.msra.mxu2 %v179_v40 }
  0x2e   :  { %122 = vmatpush.msra.mxu0 %v91_v24 }
  0x2f   :  { %163 = vmatpush.msra.mxu1 %v132_v30  ;;  %199 = vmatpush.msra.mxu2 %v178_v41 }
  0x30   :  { %123 = vmatpush.msra.mxu0 %v90_v26 }
  0x31   :  { %164 = vmatpush.msra.mxu1 %v131_v31  ;;  %200 = vmatpush.msra.mxu2 %v177_v42 }
  0x32   :  { %124 = vmatpush.msra.mxu0 %v89_v28 }
  0x33   :  { %125 = vmatmul.f32.vlgmr.msra.gmra.mxu0 %v88_v29  ;;  %165 = vmatpush.msra.mxu1 %v130_v32 }
  0x34   :  { %201 = vmatpush.msra.mxu2 %v176_v43 }
  0x36   :  { %202 = vmatpush.msra.mxu2 %v175_v44 }
  0x38   :  { %203 = vmatpush.msra.mxu2 %v174_v45 }
  0x3a   :  { %204 = vmatpush.msra.mxu2 %v173_v50 }
  0x3c   :  { %205 = vmatpush.msra.mxu2 %v172_v51 }
  0x3e   :  { %206 = vmatpush.msra.mxu2 %v171_v52 }
  0xb0   :  { %v126_v47 = vpop.f32.mrf.mxu0 }
  0xb1   :  { %v127_v48 = vadd.f32 %v253_v46, %v126_v47 }
  0xb3   :  { %v129_v49 = vmax.f32 %v127_v48, 0.0 }
  0xb5   :  { %166 = vmatmul.f32.vlgmr.msra.gmra.mxu1 %v129_v49 }
 0x132   :  { %v167_v54 = vpop.f32.mrf.mxu1 }
 0x133   :  { %v168_v55 = vadd.f32 %v254_v53, %v167_v54 }
 0x135   :  { %v170_v56 = vmax.f32 %v168_v55, 0.0 }
 0x137   :  { %207 = vmatmul.f32.vlgmr.msra.gmra.mxu2 %v170_v56 }
 0x1ba   :  { %v208_v60 = vpop.f32.mrf.mxu2 }
 0x1bb   :  { %v209_v61 = vadd.f32 %v255_v58, %v208_v60 }
 0x1bd   :  { %v211_v62 = vadd.f32 %v209_v61, %v88_v29 }
 0x1bf   :  { %v215_v63 = vsel %vm214_vm0, %v211_v62, -inf }
 0x1c0   :  { %216 = vmax.xlane.f32.xlu0 %v215_v63 }
 0x233   :  { %v217_v0 = vpop.xlane.xlu0 %216 }
 0x234   :  { %v218_v1 = vsub.f32 %v215_v63, %v217_v0 }
 0x236   :  { %v219_v2 = vmul.f32 1.442695, %v218_v1 }
 0x238   :  { %256 = vpow2.f32 %v219_v2 }
 0x23e   :  { %v257_v3 = vpop.eup %256 }
 0x23f   :  { %221 = vadd.xlane.f32.xlu0 %v257_v3 }
 0x2b2   :  { %v222_v4 = vpop.xlane.xlu0 %221 }
 0x2b3   :  { %258 = vlog2.f32 %v222_v4 }
 0x2b9   :  { %v259_v5 = vpop.eup %258 }
 0x2ba   :  { %v224_v6 = vmul.f32 0.6931472, %v259_v5 }
 0x2bc   :  { %v225_v7 = vsub.f32 %v218_v1, %v224_v6 }
 0x2be   :  { %226 = vst [vmem:[#allocation10] sm:$0xff] %v225_v7 }
 0x2bf   :  { %237 = dma.vmem_to_hbm [thread:$0]  %s233_s24, 128, %s235_s26, [#allocation4]  }
 0x2c0   :  { %386 = dma.done.wait [#allocation4], 128  }
 0x2c1   :  { %387 = vsyncadd [#allocation4], 4294967168 }
 0x2c2   :  { %242 = vsyncpa [#allocation3], 1 }
 0x2c3   :  { %243 = vsyncpa [#allocation6], 1 }
 0x2c4   :  { %244 = vsyncpa [#allocation9], 1 }
 0x2c5   :  { %245 = vsyncpa [#allocation4], 1 }

</bundles_post_ra>
